<compile_context>
chip_gen: v5e
topology: v5e:2x2
jax: 0.10.0
libtpu: 0.0.40
codegen_flags: <defaults>
</compile_context>

<pallas_src>
import jax
import jax.numpy as jnp
from jax.experimental import pallas as pl
from jax.experimental.pallas import tpu as pltpu

LN_EPS = 1e-5                      # nn.LayerNorm default
_RESIDENT_TABLE_BYTES = 2 << 20    # <= 2 MiB table -> keep it resident in VMEM
_TS_CANDIDATES = (256, 128, 64, 32, 16, 8)


def _layernorm_store(emb, gamma_ref, beta_ref, out_ref):
    """One-pass LayerNorm over the last (lane) dim + write (gamma folded into scale)."""
    d = emb.shape[-1]
    inv_d = 1.0 / d
    s = jnp.sum(emb, axis=-1, keepdims=True)
    sq = jnp.sum(emb * emb, axis=-1, keepdims=True)
    mean = s * inv_d
    var = sq * inv_d - mean * mean
    inv = jax.lax.rsqrt(var + LN_EPS)                      # EUP
    out_ref[...] = (emb - mean) * (inv * gamma_ref[...]) + beta_ref[...]


# ---------------------------------------------------------------------------
# Fast path: token table resident in VMEM, gather = dynamic VMEM row reads.
# ---------------------------------------------------------------------------
def _embed_kernel_resident(ids_ref,      # (S,) int32 SMEM (scalar prefetch)
                           tok_ref,      # (V, D) VMEM (resident, constant index map)
                           pos_ref,      # (TS, D) VMEM block
                           gamma_ref,    # (1, D) VMEM
                           beta_ref,     # (1, D) VMEM
                           out_ref,      # (TS, D) VMEM block
                           gather_buf):  # (TS, D) VMEM scratch
    tile = pl.program_id(0)
    ts = out_ref.shape[0]
    base = tile * ts
    for r in range(ts):                              # static -> unrolled
        tok_id = ids_ref[base + r]                   # SMEM scalar read
        gather_buf[pl.ds(r, 1), :] = tok_ref[pl.ds(tok_id, 1), :]   # vld + vst
    emb = gather_buf[...].astype(jnp.float32) + pos_ref[...].astype(jnp.float32)
    _layernorm_store(emb, gamma_ref, beta_ref, out_ref)


# ---------------------------------------------------------------------------
# Large-vocab path: table stays in HBM, per-row DMAs double-buffered across
# grid steps (prefetch tile i+1 while computing tile i).
# ---------------------------------------------------------------------------
def _embed_kernel_hbm(ids_ref,      # (S,) int32 SMEM (scalar prefetch)
                      tok_hbm,      # (V, D) HBM ref (memory_space=pl.ANY)
                      pos_ref,      # (TS, D) VMEM block
                      gamma_ref,    # (1, D) VMEM
                      beta_ref,     # (1, D) VMEM
                      out_ref,      # (TS, D) VMEM block
                      gather_buf,   # (2, TS, D) VMEM scratch (double buffer)
                      sems):        # (2,) DMA semaphores (one per slot)
    tile = pl.program_id(0)
    n_tiles = pl.num_programs(0)
    ts = out_ref.shape[0]
    slot = tile % 2

    def issue(tile_idx, dst_slot):
        base = tile_idx * ts
        for r in range(ts):
            tok_id = ids_ref[base + r]               # SMEM reads happen BEFORE any wait
            pltpu.make_async_copy(
                tok_hbm.at[pl.ds(tok_id, 1)],        # (1, D) HBM row
                gather_buf.at[dst_slot, pl.ds(r, 1)],
                sems.at[dst_slot],
            ).start()

    @pl.when(tile == 0)
    def _():
        issue(tile, slot)                            # prime the very first tile

    @pl.when(tile + 1 < n_tiles)
    def _():
        issue(tile + 1, 1 - slot)                    # prefetch next tile pre-wait

    # Wait for the current tile's rows (shared per-slot semaphore, per-row waits).
    for r in range(ts):
        pltpu.make_async_copy(
            tok_hbm.at[pl.ds(0, 1)],
            gather_buf.at[slot, pl.ds(r, 1)],
            sems.at[slot],
        ).wait()

    emb = gather_buf[slot].astype(jnp.float32) + pos_ref[...].astype(jnp.float32)
    _layernorm_store(emb, gamma_ref, beta_ref, out_ref)


def _pick_seq_tile(S, D, dtype_bytes):
    """Largest sublane-friendly tile dividing S; >=2 tiles when S >= 16 (v7x dual TC)."""
    if S < 16:
        return S                                   # full-array block is always legal
    budget = 24 * 1024 * 1024                      # stay well under v7x's 64 MiB VMEM
    cap = max(8, budget // (6 * D * max(dtype_bytes, 4)))
    for ts in _TS_CANDIDATES:
        if ts <= cap and S % ts == 0 and S // ts >= 2:
            return ts
    return S                                       # fallback: single full-S tile


def _vmem_limit_bytes(need):
    # >= 32 MiB (covers v5e's 16 MiB scoped default), <= 64 MiB (v7x physical).
    return int(min(64 * 1024 * 1024, max(32 * 1024 * 1024, int(1.25 * need) + (2 << 20))))


def embedding_forward(token_ids, tok_table, pos_table, gamma, beta, max_seq_length,
                      *, force_hbm_gather=False):
    """token_ids: (S0,) int.  Returns (S, D) float32 with S = min(S0, max_seq_length)."""
    V, D = tok_table.shape
    S = min(int(token_ids.shape[0]), int(max_seq_length))
    if S == 0:
        return jnp.zeros((0, D), jnp.float32)      # empty-sequence guard

    # Glue (plain JAX): truncate, clamp ids so the row gather is always in-bounds.
    ids = jnp.clip(token_ids[:S].astype(jnp.int32), 0, V - 1)        # (S,)
    pos_emb = pos_table[:S, :]                                       # (S, D)
    gamma2 = gamma.reshape(1, D)
    beta2 = beta.reshape(1, D)

    tok_bytes = tok_table.dtype.itemsize
    pos_bytes = pos_emb.dtype.itemsize
    TS = _pick_seq_tile(S, D, tok_bytes)
    grid = (S // TS,)

    resident = (not force_hbm_gather) and (V * D * tok_bytes <= _RESIDENT_TABLE_BYTES)

    if resident:
        need = (2 * V * D * tok_bytes            # resident table (conservative 2x)
                + 2 * TS * D * pos_bytes         # pos (double-buffered)
                + 2 * TS * D * 4                 # out (double-buffered)
                + TS * D * tok_bytes)            # gather scratch
        grid_spec = pltpu.PrefetchScalarGridSpec(
            num_scalar_prefetch=1,                                   # ids -> SMEM
            grid=grid,
            in_specs=[
                pl.BlockSpec((V, D), lambda i, ids_ref: (0, 0)),     # table resident in VMEM
                pl.BlockSpec((TS, D), lambda i, ids_ref: (i, 0)),    # position rows
                pl.BlockSpec((1, D), lambda i, ids_ref: (0, 0)),     # gamma
                pl.BlockSpec((1, D), lambda i, ids_ref: (0, 0)),     # beta
            ],
            out_specs=pl.BlockSpec((TS, D), lambda i, ids_ref: (i, 0)),
            scratch_shapes=[pltpu.VMEM((TS, D), tok_table.dtype)],
        )
        kernel = _embed_kernel_resident
        dim_sem = ("parallel",)                  # shard seq tiles across TCs (v7x)
    else:
        need = (2 * TS * D * pos_bytes
                + 2 * TS * D * 4
                + 2 * TS * D * tok_bytes)        # double-buffered gather slots
        grid_spec = pltpu.PrefetchScalarGridSpec(
            num_scalar_prefetch=1,
            grid=grid,
            in_specs=[
                pl.BlockSpec(memory_space=pl.ANY),                   # table stays in HBM
                pl.BlockSpec((TS, D), lambda i, ids_ref: (i, 0)),
                pl.BlockSpec((1, D), lambda i, ids_ref: (0, 0)),
                pl.BlockSpec((1, D), lambda i, ids_ref: (0, 0)),
            ],
            out_specs=pl.BlockSpec((TS, D), lambda i, ids_ref: (i, 0)),
            scratch_shapes=[
                pltpu.VMEM((2, TS, D), tok_table.dtype),             # double-buffered gather
                pltpu.SemaphoreType.DMA((2,)),                       # one sem per slot
            ],
        )
        kernel = _embed_kernel_hbm
        # Cross-iteration prefetch state (slot parity, primed-next-tile) needs
        # strictly sequential traversal of the sequence axis -> "arbitrary".
        dim_sem = ("arbitrary",)

    return pl.pallas_call(
        kernel,
        out_shape=jax.ShapeDtypeStruct((S, D), jnp.float32),
        grid_spec=grid_spec,
        compiler_params=pltpu.CompilerParams(
            dimension_semantics=dim_sem,
            vmem_limit_bytes=_vmem_limit_bytes(need)),
    )(ids, tok_table, pos_emb, gamma2, beta2)


def reference_forward(token_ids, tok_table, pos_table, gamma, beta, max_seq_length):
    S = min(token_ids.shape[0], max_seq_length)
    ids = token_ids[:S].astype(jnp.int32)
    emb = tok_table[ids] + pos_table[:S]
    mean = jnp.mean(emb, axis=-1, keepdims=True)
    var = jnp.mean((emb - mean) ** 2, axis=-1, keepdims=True)
    normed = (emb - mean) / jnp.sqrt(var + LN_EPS)
    return normed * gamma[None, :] + beta[None, :]


if __name__ == "__main__":
    vocab_size = 256
    embedding_dim = 128
    max_seq_length = 32

    key = jax.random.PRNGKey(0)
    k_tok, k_pos, k_ids = jax.random.split(key, 3)

    # Deterministic init: normal(0, 0.02) like the PyTorch module; LN gamma=1, beta=0.
    tok_table = 0.02 * jax.random.normal(k_tok, (vocab_size, embedding_dim), jnp.float32)
    pos_table = 0.02 * jax.random.normal(k_pos, (max_seq_length, embedding_dim), jnp.float32)
    gamma = jnp.ones((embedding_dim,), jnp.float32)
    beta = jnp.zeros((embedding_dim,), jnp.float32)

    # Case 1: resident-table fast path (S=24 -> TS=8, grid=(3,)).
    ids_a = jax.random.randint(k_ids, (24,), 0, vocab_size, dtype=jnp.int32)
    out_a = jax.block_until_ready(
        embedding_forward(ids_a, tok_table, pos_table, gamma, beta, max_seq_length))
    ref_a = reference_forward(ids_a, tok_table, pos_table, gamma, beta, max_seq_length)
    assert out_a.shape == (24, embedding_dim)
    assert jnp.allclose(out_a, ref_a, atol=1e-4, rtol=1e-4), "resident path mismatch"

    # Case 2: HBM-gather path with cross-tile double-buffered DMAs (forced).
    out_b = jax.block_until_ready(
        embedding_forward(ids_a, tok_table, pos_table, gamma, beta, max_seq_length,
                          force_hbm_gather=True))
    assert jnp.allclose(out_b, ref_a, atol=1e-4, rtol=1e-4), "HBM path mismatch"

    # Case 3: sequence longer than max_seq_length (truncation; S=32 -> TS=16, grid=(2,)).
    ids_c = jax.random.randint(jax.random.PRNGKey(1), (40,), 0, vocab_size, dtype=jnp.int32)
    out_c = jax.block_until_ready(
        embedding_forward(ids_c, tok_table, pos_table, gamma, beta, max_seq_length))
    ref_c = reference_forward(ids_c, tok_table, pos_table, gamma, beta, max_seq_length)
    assert out_c.shape == (32, embedding_dim)
    assert jnp.allclose(out_c, ref_c, atol=1e-4, rtol=1e-4), "truncation case mismatch"

    # TODO(synk): dropout is identity here (eval mode); training-mode dropout would
    # need pltpu.prng_seed / prng_random_bits inside the kernel.
    print("KERNEL_OK")
</pallas_src>

<mosaic_0001>
module attributes {stable_mosaic.version = 11 : i64} {
  func.func @_embed_kernel_resident(%arg0: i32, %arg1: memref<24xi32, #tpu.memory_space<smem>>, %arg2: memref<256x128xf32, #tpu.memory_space<vmem>>, %arg3: memref<8x128xf32, #tpu.memory_space<vmem>>, %arg4: memref<1x128xf32, #tpu.memory_space<vmem>>, %arg5: memref<1x128xf32, #tpu.memory_space<vmem>>, %arg6: memref<8x128xf32, #tpu.memory_space<vmem>>, %arg7: memref<8x128xf32, #tpu.memory_space<vmem>>) attributes {dimension_semantics = [#tpu.dimension_semantics<parallel>], iteration_bounds = array<i64: 3>, scalar_prefetch = 1 : i64, scratch_operands = 1 : i64, tpu.core_type = #tpu.core_type<tc>, window_params = [{pipeline_mode = #tpu.pipeline_mode<synchronous>, transform_indices = @transform_0, window_bounds = array<i64: 256, 128>}, {transform_indices = @transform_1, window_bounds = array<i64: 8, 128>}, {pipeline_mode = #tpu.pipeline_mode<synchronous>, transform_indices = @transform_2, window_bounds = array<i64: 1, 128>}, {pipeline_mode = #tpu.pipeline_mode<synchronous>, transform_indices = @transform_3, window_bounds = array<i64: 1, 128>}, {transform_indices = @transform_4, window_bounds = array<i64: 8, 128>}]} {
    %c8_i32 = arith.constant 8 : i32
    %0 = arith.muli %arg0, %c8_i32 : i32
    %c0_i32 = arith.constant 0 : i32
    %1 = arith.addi %0, %c0_i32 : i32
    %2 = arith.index_cast %1 : i32 to index
    %3 = memref.load %arg1[%2] : memref<24xi32, #tpu.memory_space<smem>>
    %4 = arith.index_cast %3 : i32 to index
    %c0 = arith.constant 0 : index
    %5 = vector.load %arg2[%4, %c0] : memref<256x128xf32, #tpu.memory_space<vmem>>, vector<1x128xf32>
    %c0_0 = arith.constant 0 : index
    %c0_1 = arith.constant 0 : index
    %6 = vector.load %arg7[%c0_0, %c0_1] : memref<8x128xf32, #tpu.memory_space<vmem>>, vector<1x128xf32>
    tpu.vector_store %arg7[%c0_0, %c0_1], %5 {strides = array<i32>} : memref<8x128xf32, #tpu.memory_space<vmem>>, vector<1x128xf32>,
    %c1_i32 = arith.constant 1 : i32
    %7 = arith.addi %0, %c1_i32 : i32
    %8 = arith.index_cast %7 : i32 to index
    %9 = memref.load %arg1[%8] : memref<24xi32, #tpu.memory_space<smem>>
    %10 = arith.index_cast %9 : i32 to index
    %c0_2 = arith.constant 0 : index
    %11 = vector.load %arg2[%10, %c0_2] : memref<256x128xf32, #tpu.memory_space<vmem>>, vector<1x128xf32>
    %c1 = arith.constant 1 : index
    %c0_3 = arith.constant 0 : index
    %12 = vector.load %arg7[%c1, %c0_3] : memref<8x128xf32, #tpu.memory_space<vmem>>, vector<1x128xf32>
    tpu.vector_store %arg7[%c1, %c0_3], %11 {strides = array<i32>} : memref<8x128xf32, #tpu.memory_space<vmem>>, vector<1x128xf32>,
    %c2_i32 = arith.constant 2 : i32
    %13 = arith.addi %0, %c2_i32 : i32
    %14 = arith.index_cast %13 : i32 to index
    %15 = memref.load %arg1[%14] : memref<24xi32, #tpu.memory_space<smem>>
    %16 = arith.index_cast %15 : i32 to index
    %c0_4 = arith.constant 0 : index
    %17 = vector.load %arg2[%16, %c0_4] : memref<256x128xf32, #tpu.memory_space<vmem>>, vector<1x128xf32>
    %c2 = arith.constant 2 : index
    %c0_5 = arith.constant 0 : index
    %18 = vector.load %arg7[%c2, %c0_5] : memref<8x128xf32, #tpu.memory_space<vmem>>, vector<1x128xf32>
    tpu.vector_store %arg7[%c2, %c0_5], %17 {strides = array<i32>} : memref<8x128xf32, #tpu.memory_space<vmem>>, vector<1x128xf32>,
    %c3_i32 = arith.constant 3 : i32
    %19 = arith.addi %0, %c3_i32 : i32
    %20 = arith.index_cast %19 : i32 to index
    %21 = memref.load %arg1[%20] : memref<24xi32, #tpu.memory_space<smem>>
    %22 = arith.index_cast %21 : i32 to index
    %c0_6 = arith.constant 0 : index
    %23 = vector.load %arg2[%22, %c0_6] : memref<256x128xf32, #tpu.memory_space<vmem>>, vector<1x128xf32>
    %c3 = arith.constant 3 : index
    %c0_7 = arith.constant 0 : index
    %24 = vector.load %arg7[%c3, %c0_7] : memref<8x128xf32, #tpu.memory_space<vmem>>, vector<1x128xf32>
    tpu.vector_store %arg7[%c3, %c0_7], %23 {strides = array<i32>} : memref<8x128xf32, #tpu.memory_space<vmem>>, vector<1x128xf32>,
    %c4_i32 = arith.constant 4 : i32
    %25 = arith.addi %0, %c4_i32 : i32
    %26 = arith.index_cast %25 : i32 to index
    %27 = memref.load %arg1[%26] : memref<24xi32, #tpu.memory_space<smem>>
    %28 = arith.index_cast %27 : i32 to index
    %c0_8 = arith.constant 0 : index
    %29 = vector.load %arg2[%28, %c0_8] : memref<256x128xf32, #tpu.memory_space<vmem>>, vector<1x128xf32>
    %c4 = arith.constant 4 : index
    %c0_9 = arith.constant 0 : index
    %30 = vector.load %arg7[%c4, %c0_9] : memref<8x128xf32, #tpu.memory_space<vmem>>, vector<1x128xf32>
    tpu.vector_store %arg7[%c4, %c0_9], %29 {strides = array<i32>} : memref<8x128xf32, #tpu.memory_space<vmem>>, vector<1x128xf32>,
    %c5_i32 = arith.constant 5 : i32
    %31 = arith.addi %0, %c5_i32 : i32
    %32 = arith.index_cast %31 : i32 to index
    %33 = memref.load %arg1[%32] : memref<24xi32, #tpu.memory_space<smem>>
    %34 = arith.index_cast %33 : i32 to index
    %c0_10 = arith.constant 0 : index
    %35 = vector.load %arg2[%34, %c0_10] : memref<256x128xf32, #tpu.memory_space<vmem>>, vector<1x128xf32>
    %c5 = arith.constant 5 : index
    %c0_11 = arith.constant 0 : index
    %36 = vector.load %arg7[%c5, %c0_11] : memref<8x128xf32, #tpu.memory_space<vmem>>, vector<1x128xf32>
    tpu.vector_store %arg7[%c5, %c0_11], %35 {strides = array<i32>} : memref<8x128xf32, #tpu.memory_space<vmem>>, vector<1x128xf32>,
    %c6_i32 = arith.constant 6 : i32
    %37 = arith.addi %0, %c6_i32 : i32
    %38 = arith.index_cast %37 : i32 to index
    %39 = memref.load %arg1[%38] : memref<24xi32, #tpu.memory_space<smem>>
    %40 = arith.index_cast %39 : i32 to index
    %c0_12 = arith.constant 0 : index
    %41 = vector.load %arg2[%40, %c0_12] : memref<256x128xf32, #tpu.memory_space<vmem>>, vector<1x128xf32>
    %c6 = arith.constant 6 : index
    %c0_13 = arith.constant 0 : index
    %42 = vector.load %arg7[%c6, %c0_13] : memref<8x128xf32, #tpu.memory_space<vmem>>, vector<1x128xf32>
    tpu.vector_store %arg7[%c6, %c0_13], %41 {strides = array<i32>} : memref<8x128xf32, #tpu.memory_space<vmem>>, vector<1x128xf32>,
    %c7_i32 = arith.constant 7 : i32
    %43 = arith.addi %0, %c7_i32 : i32
    %44 = arith.index_cast %43 : i32 to index
    %45 = memref.load %arg1[%44] : memref<24xi32, #tpu.memory_space<smem>>
    %46 = arith.index_cast %45 : i32 to index
    %c0_14 = arith.constant 0 : index
    %47 = vector.load %arg2[%46, %c0_14] : memref<256x128xf32, #tpu.memory_space<vmem>>, vector<1x128xf32>
    %c7 = arith.constant 7 : index
    %c0_15 = arith.constant 0 : index
    %48 = vector.load %arg7[%c7, %c0_15] : memref<8x128xf32, #tpu.memory_space<vmem>>, vector<1x128xf32>
    tpu.vector_store %arg7[%c7, %c0_15], %47 {strides = array<i32>} : memref<8x128xf32, #tpu.memory_space<vmem>>, vector<1x128xf32>,
    %c0_16 = arith.constant 0 : index
    %c0_17 = arith.constant 0 : index
    %49 = vector.load %arg7[%c0_16, %c0_17] : memref<8x128xf32, #tpu.memory_space<vmem>>, vector<8x128xf32>
    %c0_18 = arith.constant 0 : index
    %c0_19 = arith.constant 0 : index
    %50 = vector.load %arg3[%c0_18, %c0_19] : memref<8x128xf32, #tpu.memory_space<vmem>>, vector<8x128xf32>
    %51 = arith.addf %49, %50 : vector<8x128xf32>
    %cst = arith.constant dense<0.000000e+00> : vector<8xf32>
    %52 = vector.multi_reduction <add>, %51, %cst [1] : vector<8x128xf32> to vector<8xf32>
    %53 = vector.shape_cast %52 : vector<8xf32> to vector<8x1xf32>
    %54 = arith.mulf %51, %51 : vector<8x128xf32>
    %cst_20 = arith.constant dense<0.000000e+00> : vector<8xf32>
    %55 = vector.multi_reduction <add>, %54, %cst_20 [1] : vector<8x128xf32> to vector<8xf32>
    %56 = vector.shape_cast %55 : vector<8xf32> to vector<8x1xf32>
    %cst_21 = arith.constant 7.812500e-03 : f32
    %57 = vector.broadcast %cst_21 : f32 to vector<8x1xf32>
    %58 = arith.mulf %53, %57 : vector<8x1xf32>
    %cst_22 = arith.constant 7.812500e-03 : f32
    %59 = vector.broadcast %cst_22 : f32 to vector<8x1xf32>
    %60 = arith.mulf %56, %59 : vector<8x1xf32>
    %61 = arith.mulf %58, %58 : vector<8x1xf32>
    %62 = arith.subf %60, %61 : vector<8x1xf32>
    %cst_23 = arith.constant 9.99999974E-6 : f32
    %63 = vector.broadcast %cst_23 : f32 to vector<8x1xf32>
    %64 = arith.addf %62, %63 : vector<8x1xf32>
    %65 = math.rsqrt %64 : vector<8x1xf32>
    %66 = vector.broadcast %58 : vector<8x1xf32> to vector<8x128xf32>
    %67 = arith.subf %51, %66 : vector<8x128xf32>
    %c0_24 = arith.constant 0 : index
    %c0_25 = arith.constant 0 : index
    %68 = vector.load %arg4[%c0_24, %c0_25] : memref<1x128xf32, #tpu.memory_space<vmem>>, vector<1x128xf32>
    %69 = vector.broadcast %65 : vector<8x1xf32> to vector<8x128xf32>
    %70 = vector.broadcast %68 : vector<1x128xf32> to vector<8x128xf32>
    %71 = arith.mulf %69, %70 : vector<8x128xf32>
    %72 = arith.mulf %67, %71 : vector<8x128xf32>
    %c0_26 = arith.constant 0 : index
    %c0_27 = arith.constant 0 : index
    %73 = vector.load %arg5[%c0_26, %c0_27] : memref<1x128xf32, #tpu.memory_space<vmem>>, vector<1x128xf32>
    %74 = vector.broadcast %73 : vector<1x128xf32> to vector<8x128xf32>
    %75 = arith.addf %72, %74 : vector<8x128xf32>
    %c0_28 = arith.constant 0 : index
    %c0_29 = arith.constant 0 : index
    %76 = vector.load %arg6[%c0_28, %c0_29] : memref<8x128xf32, #tpu.memory_space<vmem>>, vector<8x128xf32>
    tpu.vector_store %arg6[%c0_28, %c0_29], %75 {strides = array<i32>} : memref<8x128xf32, #tpu.memory_space<vmem>>, vector<8x128xf32>,
    return
  }
  func.func @transform_0(%arg0: i32, %arg1: memref<24xi32, #tpu.memory_space<smem>>) -> (i32, i32) {
    %c0_i32 = arith.constant 0 : i32
    %c0_i32_0 = arith.constant 0 : i32
    %c0_i32_1 = arith.constant 0 : i32
    return %c0_i32, %c0_i32_0 : i32, i32
  }
  func.func @transform_1(%arg0: i32, %arg1: memref<24xi32, #tpu.memory_space<smem>>) -> (i32, i32) {
    %c0_i32 = arith.constant 0 : i32
    %c0_i32_0 = arith.constant 0 : i32
    return %arg0, %c0_i32 : i32, i32
  }
  func.func @transform_2(%arg0: i32, %arg1: memref<24xi32, #tpu.memory_space<smem>>) -> (i32, i32) {
    %c0_i32 = arith.constant 0 : i32
    %c0_i32_0 = arith.constant 0 : i32
    %c0_i32_1 = arith.constant 0 : i32
    return %c0_i32, %c0_i32_0 : i32, i32
  }
  func.func @transform_3(%arg0: i32, %arg1: memref<24xi32, #tpu.memory_space<smem>>) -> (i32, i32) {
    %c0_i32 = arith.constant 0 : i32
    %c0_i32_0 = arith.constant 0 : i32
    %c0_i32_1 = arith.constant 0 : i32
    return %c0_i32, %c0_i32_0 : i32, i32
  }
  func.func @transform_4(%arg0: i32, %arg1: memref<24xi32, #tpu.memory_space<smem>>) -> (i32, i32) {
    %c0_i32 = arith.constant 0 : i32
    %c0_i32_0 = arith.constant 0 : i32
    return %arg0, %c0_i32 : i32, i32
  }
}

</mosaic_0001>

<bundles_post_ra>
// kernel: tpu_custom_call.1
= control target key start
LH: loop header
LB: loop body
LE: loop exit
PB: predicated region body
PF: predicated region fallthrough
CT: control target
= control target key end

     0   :  { %s648_s21 = smov [#allocation4]   ;;  %s843_s0 = inlined_call_operand.hbm [shape: s32[24], index: 0, kind: input, shape index: {}]   ;;  %s844_s1 = inlined_call_operand.hbm [shape: f32[256,128], index: 1, kind: input, shape index: {}]   ;;  %s845_s2 = inlined_call_operand.hbm [shape: f32[24,128], index: 2, kind: input, shape index: {}]   ;;  %s846_s3 = inlined_call_operand.vmem [shape: f32[1,128], index: 3, kind: input, shape index: {}]   ;;  %s847_s4 = inlined_call_operand.vmem [shape: f32[1,128], index: 4, kind: input, shape index: {}]   ;;  %s848_s5 = inlined_call_operand.hbm [shape: f32[24,128], index: 5, kind: output, shape index: {}]  }
   0x1   :  { %850 = sst [smem:[#allocation16_spill]] %s844_s1  ;;  %s11_s20 = sshll.u32 %s843_s0, 4  ;;  %s12_s20 = int_to_ptr.hbm [resolvable:$true] %s11_s20 }
   0x2   :  { %851 = sst [smem:[#allocation17_spill]] %s845_s2 }
   0x3   :  { %14 = dma.hbm_to_smem %s12_s20, 16, %s648_s21, [#allocation3] }
   0x4   :  { %618 = dma.done.wait [#allocation3], 16 }
   0x5   :  { %619 = vsyncadd [#allocation3], 4294967280 }
   0x6   :  { %17 = sfence }
   0x7   :  { %18 = vsyncpa [#allocation6], 0 }
   0x8   :  { %19 = vsyncpa [#allocation9], 0 }
   0x9   :  { %21 = vsyncpa [#allocation9 + $0x1], 0 }
   0xa   :  { %22 = vsyncpa [#allocation7], 0 }
   0xb   :  { %24 = vsyncpa [#allocation7 + $0x1], 0  ;;  %s685_s22 = smov 0   ;;  %s687_s23 = smov 0  }
   0xc   :  { %s689_s24 = smov 0   ;;  %s691_s25 = smov 0  }
   0xd LB: > { %s852_s1 = sld [smem:[#allocation16_spill]]  ;;  %s709_s28 = sadd.s32 4294967295, %s646_s25   ;;  %s646_s25 = sphi %s691_s25, %s865_s25   ;;  %s642_s24 = sphi %s689_s24, %s864_s24   ;;  %s638_s23 = sphi %s687_s23, %s863_s23   ;;  %s634_s22 = sphi %s685_s22, %s862_s22  }
   0xe   : > { %p424_p0 = scmp.ge.s32.totalorder %s646_s25, 1  ;;  %p72_p1 = scmp.eq.s32.totalorder %s709_s28, 0 }
   0xf   : > { %p150_p2 = scmp.lt.s32.totalorder %s646_s25, 4  ;;  %s649_s30 = smov [#allocation5]  }
  0x10   : > { %s163_s6 = sshll.u32 %s649_s30, 4  ;;  %s650_s7 = smov 128   ;;  %s164_s6 = int_to_ptr.vmem [resolvable:$true] %s163_s6 }
  0x11   : > { %p714_p3 = pnand %p424_p0, %p150_p2  ;;  %s651_s8 = smov 8  }
  0x12   : > { %s423_s9 = sadd.s32 4294967294, %s646_s25   ;;  %s724_s10 = sadd.s32 1, %s646_s25  }
  0x13   : > { %s161_s27 = sshll.u32 %s852_s1, 4  ;;  %p446_p4 = pneg %p714_p3  ;;  %s162_s27 = int_to_ptr.hbm [resolvable:$true] %s161_s27 }
  0x14   : > { %s58_s11 = sadd.s32 1, %s642_s24  ;;  %s55_s12 = ssub.s32 %s646_s25, %s724_s10 }
  0x15   : > { %p447_p5 = pnand %p446_p4, %p72_p1  ;;  %p65_p6 = scmp.ne.s32.totalorder %s642_s24, %s638_s23 }
  0x16   : > { %p56_p7 = scmp.eq.s32.totalorder %s55_s12, 0  ;;  %p66_p8 = scmp.eq.s32.totalorder %s646_s25, 0 }
  0x17   : > { %449 = dma.hbm_to_vmem [thread:$0]  (!%p447_p5), %s162_s27, 4096, %s164_s6, [#allocation6], %s650_s7, %s650_s7, %s651_s8  }
  0x18   : > { %p71_p9 = scmp.ne.s32.totalorder %s638_s23, %s634_s22  ;;  %p137_p10 = scmp.eq.s32.totalorder %s709_s28, 2 }
  0x19   : > { %s736_s13 = scalar_select %p56_p7, %s642_s24, %s58_s11  }
  0x1a   : > { %p740_p11 = por %p72_p1, %p71_p9  ;;  %p744_p12 = por %p137_p10, %p65_p6 }
  0x1b   : > { %854 = sst [smem:[#allocation15_spill]] %s736_s13  ;;  %p143_p13 = scmp.eq.s32.totalorder %s423_s9, 2 }
  0x1c   : > { %p67_p0 = por %p66_p8, %p65_p6  ;;  %s183_s16 = sand.u32 1, %s642_s24  }
  0x1d   : > { %p749_p2 = por %p143_p13, %p71_p9  ;;  %p459_p4 = scmp.lt.s32.totalorder %s646_s25, 3 }
  0x1e   : > { %s427_s18 = sshll.u32 %s183_s16, 3  ;;  %s428_s19 = sshll.u32 %s646_s25, 3 }
  0x1f   : > { %s858_s2 = sld [smem:[#allocation17_spill]]  ;;  %s187_s27 = scalar_lea.vmem [#allocation8], %s427_s18 }
  0x20   : > { %s195_s30 = sshll.u32 %s187_s27, 4  ;;  %p758_p5 = pnand %p459_p4, %p67_p0  ;;  %s196_s30 = int_to_ptr.vmem [resolvable:$true] %s195_s30 }
  0x21   : > { %s184_s7 = scalar_lea.sflag [#allocation9], %s183_s16 }
  0x22   : > { %p548_p7 = pneg %p758_p5 }
  0x25   : > { %s191_s0 = scalar_lea.hbm %s858_s2, %s428_s19  ;;  %s551_s18 = scalar_lea.hbm %s858_s2, 24 }
  0x26   : > { %s193_s26 = sshll.u32 %s191_s0, 4  ;;  %s194_s26 = int_to_ptr.hbm [resolvable:$true] %s193_s26 }
  0x27   : > { %s544_s8 = sshra.s32 %s194_s26, 4  ;;  %s545_s8 = int_to_ptr.hbm [resolvable:$true] %s544_s8 }
  0x28   : > { %s546_s9 = scalar_lea.hbm %s545_s8, 8  ;;  %p552_p10 = scmp.lt.s32.totalorder %s545_s8, %s858_s2 }
  0x29   : > { %p547_p6 = scmp.ne.s32.totalorder %s545_s8, %s546_s9  ;;  %p553_p13 = scmp.lt.s32.totalorder %s551_s18, %s546_s9 }
  0x2b   : > { %p549_p8 = pnand %p548_p7, %p547_p6  ;;  %p554_p0 = por %p553_p13, %p552_p10 }
  0x2d   : > { %p550_p9 = pneg %p549_p8 }
  0x2f   : > { %p555_p4 = pnand %p554_p0, %p550_p9 }
  0x31   : > { %558 = shalt.err (!%p555_p4)
}
  0x32   : > { %453 = dma.hbm_to_vmem [thread:$0]  (!%p758_p5), %s194_s26, 128, %s196_s30, %s184_s7  }
  0x33   : > { %204 = sbr.rel (%p714_p3) target bundleno = 245 (0xf5), region = 36 }
  0x38   : > { %621 = dma.done.wait (%p72_p1), [#allocation6], 4096  }
  0x39   : > { %623 = vsyncadd (%p72_p1), [#allocation6], 4294963200  ;;  %s779_s16 = sand.u32 1, %s638_s23  }
  0x3a   : > { %s849_s21 = sshll.u32 %s779_s16, 3  ;;  %s212_s0 = scalar_lea.sflag [#allocation9], %s779_s16 }
  0x3b   : > { %s785_s26 = scalar_lea.vmem [#allocation8], %s849_s21 }
  0x3c   : > { %625 = dma.done.wait (%p740_p11), %s212_s0, 128  }
  0x3d   : > { %627 = vsyncadd (%p740_p11), %s212_s0, 4294967168  ;;  %s792_s29 = sshll.u32 %s709_s28, 3  ;;  %v282_v8 = vld [vmem:[%s785_s26] sm:$0xff]  ;;  %v498_v24 = vld [vmem:[%s846_s3] ss:$0 sm:$0xff] }
  0x3e   : > { %s242_s27 = sld [smem:[#allocation4 + %s792_s29]]  ;;  %s246_s30 = sadd.s32 1, %s792_s29  ;;  %v499_v29 = vld [vmem:[%s847_s4] ss:$0 sm:$0xff] }
  0x3f   : > { %s247_s6 = sld [smem:[#allocation4 + %s246_s30]]  ;;  %s251_s7 = sadd.s32 2, %s792_s29 }
  0x40   : > { %s252_s8 = sld [smem:[#allocation4 + %s251_s7]]  ;;  %s256_s9 = sadd.s32 3, %s792_s29 }
  0x41   : > { %s257_s11 = sld [smem:[#allocation4 + %s256_s9]]  ;;  %s261_s14 = sadd.s32 4, %s792_s29 }
  0x42   : > { %s262_s12 = sld [smem:[#allocation4 + %s261_s14]]  ;;  %s266_s18 = sadd.s32 5, %s792_s29 }
  0x43   : > { %s267_s28 = sld [smem:[#allocation4 + %s266_s18]]  ;;  %s271_s19 = sadd.s32 6, %s792_s29 }
  0x44   : > { %s272_s20 = sld [smem:[#allocation4 + %s271_s19]]  ;;  %s243_s0 = scalar_lea.vmem [#allocation5], %s242_s27 }
  0x45   : > { %v244_v0 = vld [vmem:[%s243_s0] sm:$0x1]  ;;  %s276_s21 = sadd.s32 7, %s792_s29  ;;  %s248_s1 = scalar_lea.vmem [#allocation5], %s247_s6 }
  0x46   : > { %245 = vst [vmem:[#allocation2] sm:$0x1] %v244_v0  ;;  %v249_v1 = vld [vmem:[%s248_s1] sm:$0x1]  ;;  %s277_s2 = sld [smem:[#allocation4 + %s276_s21]]  ;;  %s253_s13 = scalar_lea.vmem [#allocation5], %s252_s8 }
  0x47   : > { %250 = vst [vmem:[#allocation2 + $0x1] sm:$0x1] %v249_v1  ;;  %v254_v2 = vld [vmem:[%s253_s13] sm:$0x1]  ;;  %s258_s30 = scalar_lea.vmem [#allocation5], %s257_s11  ;;  %s328_s26 = scalar_lea.hbm %s848_s5, %s792_s29 }
  0x48   : > { %255 = vst [vmem:[#allocation2 + $0x2] sm:$0x1] %v254_v2  ;;  %v259_v3 = vld [vmem:[%s258_s30] sm:$0x1]  ;;  %s263_s7 = scalar_lea.vmem [#allocation5], %s262_s12  ;;  %s860_s14 = sshll.u32 %s779_s16, 3 }
  0x49   : > { %260 = vst [vmem:[#allocation2 + $0x3] sm:$0x1] %v259_v3  ;;  %v264_v4 = vld [vmem:[%s263_s7] sm:$0x1]  ;;  %s268_s9 = scalar_lea.vmem [#allocation5], %s267_s28  ;;  %s240_s12 = scalar_lea.vmem [#allocation10], %s860_s14 }
  0x4a   : > { %265 = vst [vmem:[#allocation2 + $0x4] sm:$0x1] %v264_v4  ;;  %v269_v5 = vld [vmem:[%s268_s9] sm:$0x1]  ;;  %s273_s27 = scalar_lea.vmem [#allocation5], %s272_s20  ;;  %s330_s18 = sshll.u32 %s240_s12, 4  ;;  %s331_s18 = int_to_ptr.vmem [resolvable:$true] %s330_s18 }
  0x4b   : > { %270 = vst [vmem:[#allocation2 + $0x5] sm:$0x1] %v269_v5  ;;  %v274_v6 = vld [vmem:[%s273_s27] sm:$0x1]  ;;  %s332_s28 = sshll.u32 %s328_s26, 4  ;;  %s318_s19 = scalar_lea.sflag [#allocation7], %s779_s16  ;;  %s333_s28 = int_to_ptr.hbm [resolvable:$true] %s332_s28 }
  0x4c   : > { %275 = vst [vmem:[#allocation2 + $0x6] sm:$0x1] %v274_v6  ;;  %s278_s6 = scalar_lea.vmem [#allocation5], %s277_s2  ;;  %s588_s20 = sshra.s32 %s333_s28, 4  ;;  %s589_s20 = int_to_ptr.hbm [resolvable:$true] %s588_s20 }
  0x4d   : > { %v279_v7 = vld [vmem:[%s278_s6] sm:$0x1]  ;;  %s590_s29 = scalar_lea.hbm %s589_s20, 8  ;;  %s594_s7 = scalar_lea.hbm %s848_s5, 24 }
  0x4e   : > { %280 = vst [vmem:[#allocation2 + $0x7] sm:$0x1] %v279_v7  ;;  %p591_p1 = scmp.ne.s32.totalorder %s589_s20, %s590_s29  ;;  %p595_p5 = scmp.lt.s32.totalorder %s589_s20, %s848_s5 }
  0x4f   : > { %p596_p6 = scmp.lt.s32.totalorder %s594_s7, %s590_s29 }
  0x50   : > { %p592_p3 = pnand %p591_p1, %p744_p12 }
  0x51   : > { %p597_p7 = por %p596_p6, %p595_p5 }
  0x52   : > { %p593_p11 = pneg %p592_p3 }
  0x54   : > { %p598_p8 = pnand %p597_p7, %p593_p11 }
  0x55   : > { %v281_v9 = vld [vmem:[#allocation2] sm:$0xff] }
  0x56   : > { %v283_v10 = vadd.f32 %v282_v8, %v281_v9 }
  0x58   : > { %284 = vadd.xlane.f32.xlu0 %v283_v10  ;;  %v286_v11 = vmul.f32 %v283_v10, %v283_v10 }
  0x60   : > { %287 = vadd.xlane.f32.xlu0 %v286_v11 }
  0xcb   : > { %v285_v12 = vpop.xlane.xlu0 %284 }
  0xcc   : > { %v289_v13 = vmul.f32 0.0078125, %v285_v12 }
  0xce   : > { %v291_v15 = vmul.f32 %v289_v13, %v289_v13  ;;  %v304_v27 = vsub.f32 %v283_v10, %v289_v13 }
  0xd3   : > { %v288_v14 = vpop.xlane.xlu0 %287 }
  0xd4   : > { %v290_v16 = vmul.f32 0.0078125, %v288_v14 }
  0xd6   : > { %v292_v17 = vsub.f32 %v290_v16, %v291_v15 }
  0xd8   : > { %v293_v18 = vadd.f32 1e-05, %v292_v17 }
  0xda   : > { %500 = vrsqrt.f32 %v293_v18  ;;  %vm300_vm1 = vweird.f32 %v293_v18 }
  0xe0   : > { %v501_v19 = vpop.eup %500 }
  0xe1   : > { %v295_v20 = vmul.f32 %v501_v19, %v293_v18  ;;  %vm301_vm0 = vweird.f32 %v501_v19 }
  0xe2   : > { %vm302_vm2 = vmor %vm300_vm1, %vm301_vm0 }
  0xe3   : > { %v296_v21 = vmul.f32 %v501_v19, %v295_v20 }
  0xe5   : > { %v297_v22 = vmul.f32 0.5, %v296_v21 }
  0xe7   : > { %v298_v23 = vsub.f32 1.5, %v297_v22 }
  0xe9   : > { %v299_v25 = vmul.f32 %v501_v19, %v298_v23 }
  0xeb   : > { %v303_v26 = vsel %vm302_vm2, %v501_v19, %v299_v25 }
  0xec   : > { %v309_v28 = vmul.f32 %v498_v24, %v303_v26 }
  0xee   : > { %v310_v30 = vmul.f32 %v309_v28, %v304_v27 }
  0xf0   : > { %v315_v31 = vadd.f32 %v499_v29, %v310_v30 }
  0xf2   : > { %316 = vst [vmem:[%s240_s12] sm:$0xff] %v315_v31 }
  0xf3   : > { %601 = shalt.err (!%p598_p8)
}
  0xf4   : > { %444 = dma.vmem_to_hbm [thread:$0]  (%p744_p12), %s331_s18, 128, %s333_s28, %s318_s19  }
  0xf5 PF: > { %p461_p9 = scmp.ge.s32.totalorder %s646_s25, 2  ;;  %s344_s16 = sand.u32 1, %s634_s22  }
  0xf6   : > { %s345_s6 = scalar_lea.sflag [#allocation7], %s344_s16 }
  0xf7   : > { %p455_p10 = pnand %p461_p9, %p749_p2 }
  0xf9   : > { %p456_p13 = pneg %p455_p10 }
  0xfb   : > { %629 = dma.done.wait (%p456_p13), %s345_s6, 128  }
  0xfc   : > { %631 = vsyncadd (%p456_p13), %s345_s6, 4294967168  ;;  %s861_s1 = sld [smem:[#allocation15_spill]]  ;;  %p27_p0 = scmp.ge.s32.totalorder %s724_s10, 5  }
  0xfd   : > { %s862_s22 = smov %s638_s23  ;;  %s863_s23 = smov %s642_s24 }
  0xfe   : > { %s865_s25 = smov %s724_s10  ;;  %29 = sbr.rel (!%p27_p0) target bundleno = 13 (0xd), region = 94 }
 0x102   : > { %s864_s24 = smov %s861_s1 }
 0x103   :  { %351 = vsyncpa [#allocation6], 1 }
 0x104   :  { %353 = vsyncpa [#allocation6 + $0x1], 1 }
 0x105   :  { %354 = vsyncpa [#allocation9], 1 }
 0x106   :  { %356 = vsyncpa [#allocation9 + $0x1], 1 }
 0x107   :  { %357 = vsyncpa [#allocation7], 1 }
 0x108   :  { %359 = vsyncpa [#allocation7 + $0x1], 1 }

</bundles_post_ra>
